<compile_context>
chip_gen: v7x
topology: tpu7x:2x2x1
jax: 0.10.0
libtpu: 0.0.40
codegen_flags: <defaults>
</compile_context>

<pallas_src>
import jax
import jax.numpy as jnp
from jax import lax
from jax.experimental import pallas as pl
from jax.experimental.pallas import tpu as pltpu

# ----------------------- model configuration (small) -----------------------
INPUT_SIZE = 4      # input_size
OUTPUT_SIZE = 16    # output_size
HIDDEN = 32         # hidden_size
NUM_LAYERS = 1
BIDIRECTIONAL = True
BATCH = 2
SEQ = 8
# TODO(synk): dropout is the identity in eval/inference mode; training-mode
# Bernoulli masking is not implemented here.


# ------------------------------- Pallas kernel ------------------------------
def encoder_kernel(x_ref,      # (T*B, 2I)  rows t*B:(t+1)*B = [x_t | x_{T-1-t}]
                   wih_ref,    # (2I, 6H)   fused/interleaved input weights
                   whh_ref,    # (2H, 6H)   block-diagonal recurrent weights
                   bgi_ref,    # (1, 6H)    folded input-side gate biases
                   bghn_ref,   # (1, 2H)    recurrent n-gate bias (fwd|bwd)
                   wlin_ref,   # (2H, 2O)   output linear (right-multiply)
                   blin_ref,   # (1, 2O)
                   out_ref):   # (B, 2O)
    B = out_ref.shape[0]
    T = x_ref.shape[0] // B
    H2 = bghn_ref.shape[1]          # 2*H  (fused fwd+bwd hidden width)

    # Load small operands once; close over them in the unrolled loop.
    whh = whh_ref[...]
    bghn = bghn_ref[...]

    # Hoisted input projection: one matmul covers both directions and all T
    # steps (removes 2*T serial MXU issue/drain latencies from the loop).
    gi_all = (jnp.dot(x_ref[...], wih_ref[...],
                      preferred_element_type=jnp.float32)
              + bgi_ref[...])                                   # (T*B, 6H)

    # Fused bidirectional recurrence, fully unrolled (T is static & small).
    h = jnp.zeros((B, H2), jnp.float32)        # [h_fwd | h_bwd]
    for s in range(T):
        gi = gi_all[s * B:(s + 1) * B, :]                       # (B, 6H)
        gh = jnp.dot(h, whh, preferred_element_type=jnp.float32)  # (B, 6H)
        r = jax.nn.sigmoid(gi[:, 0:H2] + gh[:, 0:H2])
        z = jax.nn.sigmoid(gi[:, H2:2 * H2] + gh[:, H2:2 * H2])
        n = jnp.tanh(gi[:, 2 * H2:3 * H2]
                     + r * (gh[:, 2 * H2:3 * H2] + bghn))
        h = (1.0 - z) * n + z * h

    # h is already concat([h_fwd, h_bwd], -1) == h_n.permute(1,0,2).reshape(B,-1)
    out_ref[...] = (jnp.dot(h, wlin_ref[...],
                            preferred_element_type=jnp.float32)
                    + blin_ref[...])                            # (B, 2O)


# --------------------------- host-side weight fusion -------------------------
def fuse_params(params):
    """Build fused, right-multiply-layout operands for the kernel.

    Column layout of the 6H gate axis: [r_f, r_b, z_f, z_b, n_f, n_b].
    """
    H, I = HIDDEN, INPUT_SIZE
    wih_fT = params["wih_f"].T      # (I, 3H), cols [r, z, n]
    wih_bT = params["wih_b"].T
    whh_fT = params["whh_f"].T      # (H, 3H)
    whh_bT = params["whh_b"].T

    wih = jnp.zeros((2 * I, 6 * H), jnp.float32)
    whh = jnp.zeros((2 * H, 6 * H), jnp.float32)
    for g in range(3):              # 0=r, 1=z, 2=n
        src = slice(g * H, (g + 1) * H)
        dst_f = slice((2 * g) * H, (2 * g + 1) * H)
        dst_b = slice((2 * g + 1) * H, (2 * g + 2) * H)
        wih = wih.at[:I, dst_f].set(wih_fT[:, src])
        wih = wih.at[I:, dst_b].set(wih_bT[:, src])
        whh = whh.at[:H, dst_f].set(whh_fT[:, src])
        whh = whh.at[H:, dst_b].set(whh_bT[:, src])

    bih_f, bhh_f = params["bih_f"], params["bhh_f"]
    bih_b, bhh_b = params["bih_b"], params["bhh_b"]
    bgi = jnp.concatenate([
        bih_f[0:H] + bhh_f[0:H],            # r_f  (both biases folded)
        bih_b[0:H] + bhh_b[0:H],            # r_b
        bih_f[H:2 * H] + bhh_f[H:2 * H],    # z_f
        bih_b[H:2 * H] + bhh_b[H:2 * H],    # z_b
        bih_f[2 * H:3 * H],                 # n_f  (input-side bias only)
        bih_b[2 * H:3 * H],                 # n_b
    ]).reshape(1, 6 * H)
    bghn = jnp.concatenate(
        [bhh_f[2 * H:3 * H], bhh_b[2 * H:3 * H]]).reshape(1, 2 * H)

    wlin = params["wlin"].T.astype(jnp.float32)     # (2H, 2O)
    blin = params["blin"].reshape(1, -1).astype(jnp.float32)
    return wih, whh, bgi, bghn, wlin, blin


# ------------------------------ host wrapper --------------------------------
def encoder_forward(x, params):
    """x: (B, T, I) float32 -> (mean, logvar), each (B, OUTPUT_SIZE)."""
    B, T, I = x.shape
    assert I == INPUT_SIZE

    # Pair each step's forward input with the matching backward-direction
    # input so one matmul produces both directions' gate pre-activations.
    x_tbi = jnp.transpose(x, (1, 0, 2))                      # (T, B, I)
    x_pair = jnp.concatenate([x_tbi, x_tbi[::-1]], axis=-1)  # (T, B, 2I)
    x_flat = x_pair.reshape(T * B, 2 * I).astype(jnp.float32)

    wih, whh, bgi, bghn, wlin, blin = fuse_params(params)
    kernel_args = (x_flat, wih, whh, bgi, bghn, wlin, blin)

    # Everything is a few KB: whole-array VMEM blocks, no grid / no tiling.
    # (On v7x, only worth adding a "parallel" batch grid if B grows well
    # beyond this toy size.)
    vmem = pl.BlockSpec(memory_space=pltpu.MemorySpace.VMEM)
    out = pl.pallas_call(
        encoder_kernel,
        out_shape=jax.ShapeDtypeStruct((B, 2 * OUTPUT_SIZE), jnp.float32),
        in_specs=[vmem] * len(kernel_args),
        out_specs=vmem,
    )(*kernel_args)

    mean = out[:, :OUTPUT_SIZE]
    logvar = out[:, OUTPUT_SIZE:]
    return mean, logvar


# ------------------------- deterministic parameters --------------------------
def build_params(key):
    """PyTorch-shaped params: GRU weight_ih (3H, I), weight_hh (3H, H),
    biases (3H,); Linear weight (2O, 2H), bias (2O,)."""
    H, I, O = HIDDEN, INPUT_SIZE, OUTPUT_SIZE
    k = 1.0 / jnp.sqrt(jnp.float32(H))
    keys = jax.random.split(key, 10)
    u = lambda kk, shape: jax.random.uniform(kk, shape, jnp.float32, -k, k)

    params = {
        "wih_f": u(keys[0], (3 * H, I)), "whh_f": u(keys[1], (3 * H, H)),
        "bih_f": u(keys[2], (3 * H,)),   "bhh_f": u(keys[3], (3 * H,)),
        "wih_b": u(keys[4], (3 * H, I)), "whh_b": u(keys[5], (3 * H, H)),
        "bih_b": u(keys[6], (3 * H,)),   "bhh_b": u(keys[7], (3 * H,)),
    }
    gru_output_size = (2 if BIDIRECTIONAL else 1) * NUM_LAYERS * H
    if gru_output_size == 2 * O:
        # nn.Identity branch -> identity matrix + zero bias.
        params["wlin"] = jnp.eye(2 * O, dtype=jnp.float32)
        params["blin"] = jnp.zeros((2 * O,), jnp.float32)
    else:
        kl = 1.0 / jnp.sqrt(jnp.float32(gru_output_size))
        params["wlin"] = jax.random.uniform(
            keys[8], (2 * O, gru_output_size), jnp.float32, -kl, kl)
        params["blin"] = jax.random.uniform(
            keys[9], (2 * O,), jnp.float32, -kl, kl)
    return params


# -------------------------- pure-JAX reference -------------------------------
def encoder_reference(x, params):
    H = HIDDEN
    B, T, _ = x.shape

    def cell(x_t, h, wih, whh, bih, bhh):
        gi = x_t @ wih.T + bih
        gh = h @ whh.T + bhh
        r = jax.nn.sigmoid(gi[:, :H] + gh[:, :H])
        z = jax.nn.sigmoid(gi[:, H:2 * H] + gh[:, H:2 * H])
        n = jnp.tanh(gi[:, 2 * H:] + r * gh[:, 2 * H:])
        return (1.0 - z) * n + z * h

    h_f = jnp.zeros((B, H), jnp.float32)
    h_b = jnp.zeros((B, H), jnp.float32)
    for t in range(T):
        h_f = cell(x[:, t], h_f, params["wih_f"], params["whh_f"],
                   params["bih_f"], params["bhh_f"])
        h_b = cell(x[:, T - 1 - t], h_b, params["wih_b"], params["whh_b"],
                   params["bih_b"], params["bhh_b"])
    feat = jnp.concatenate([h_f, h_b], axis=-1)
    out = feat @ params["wlin"].T + params["blin"]
    return out[:, :OUTPUT_SIZE], out[:, OUTPUT_SIZE:]


# ------------------------------------ main -----------------------------------
if __name__ == "__main__":
    key = jax.random.PRNGKey(0)
    key_x, key_p = jax.random.split(key)

    x = jax.random.normal(key_x, (BATCH, SEQ, INPUT_SIZE), jnp.float32)
    params = build_params(key_p)

    mean, logvar = encoder_forward(x, params)
    jax.block_until_ready((mean, logvar))

    mean_ref, logvar_ref = encoder_reference(x, params)
    assert mean.shape == (BATCH, OUTPUT_SIZE) and logvar.shape == (BATCH, OUTPUT_SIZE)
    assert jnp.allclose(mean, mean_ref, atol=1e-3, rtol=1e-3)
    assert jnp.allclose(logvar, logvar_ref, atol=1e-3, rtol=1e-3)

    print("KERNEL_OK")
</pallas_src>

<mosaic_0001>
module attributes {stable_mosaic.version = 11 : i64} {
  func.func @encoder_kernel(%arg0: memref<16x8xf32, #tpu.memory_space<vmem>>, %arg1: memref<8x192xf32, #tpu.memory_space<vmem>>, %arg2: memref<64x192xf32, #tpu.memory_space<vmem>>, %arg3: memref<1x192xf32, #tpu.memory_space<vmem>>, %arg4: memref<1x64xf32, #tpu.memory_space<vmem>>, %arg5: memref<64x32xf32, #tpu.memory_space<vmem>>, %arg6: memref<1x32xf32, #tpu.memory_space<vmem>>, %arg7: memref<2x32xf32, #tpu.memory_space<vmem>>) attributes {dimension_semantics = [], scalar_prefetch = 0 : i64, scratch_operands = 0 : i64, tpu.core_type = #tpu.core_type<tc>} {
    %c0 = arith.constant 0 : index
    %c0_0 = arith.constant 0 : index
    %0 = vector.load %arg2[%c0, %c0_0] : memref<64x192xf32, #tpu.memory_space<vmem>>, vector<64x192xf32>
    %c0_1 = arith.constant 0 : index
    %c0_2 = arith.constant 0 : index
    %1 = vector.load %arg4[%c0_1, %c0_2] : memref<1x64xf32, #tpu.memory_space<vmem>>, vector<1x64xf32>
    %c0_3 = arith.constant 0 : index
    %c0_4 = arith.constant 0 : index
    %2 = vector.load %arg0[%c0_3, %c0_4] : memref<16x8xf32, #tpu.memory_space<vmem>>, vector<16x8xf32>
    %c0_5 = arith.constant 0 : index
    %c0_6 = arith.constant 0 : index
    %3 = vector.load %arg1[%c0_5, %c0_6] : memref<8x192xf32, #tpu.memory_space<vmem>>, vector<8x192xf32>
    %cst = arith.constant dense<0.000000e+00> : vector<16x192xf32>
    %4 = tpu.matmul %2, %3, %cst {dimension_numbers = #tpu.dot_dimension_numbers<[1], [0], [0], [1], [0, 0, 1, 1], [], []>} : vector<16x8xf32>, vector<8x192xf32>, vector<16x192xf32> -> vector<16x192xf32>
    %c0_7 = arith.constant 0 : index
    %c0_8 = arith.constant 0 : index
    %5 = vector.load %arg3[%c0_7, %c0_8] : memref<1x192xf32, #tpu.memory_space<vmem>>, vector<1x192xf32>
    %6 = vector.broadcast %5 : vector<1x192xf32> to vector<16x192xf32>
    %7 = arith.addf %4, %6 : vector<16x192xf32>
    %cst_9 = arith.constant 0.000000e+00 : f32
    %8 = vector.broadcast %cst_9 : f32 to vector<2x64xf32>
    %9 = vector.extract_strided_slice %7 {offsets = [0, 0], sizes = [2, 192], strides = [1, 1]} : vector<16x192xf32> to vector<2x192xf32>
    %cst_10 = arith.constant dense<0.000000e+00> : vector<2x192xf32>
    %10 = tpu.matmul %8, %0, %cst_10 {dimension_numbers = #tpu.dot_dimension_numbers<[1], [0], [0], [1], [0, 0, 1, 1], [], []>} : vector<2x64xf32>, vector<64x192xf32>, vector<2x192xf32> -> vector<2x192xf32>
    %11 = vector.extract_strided_slice %9 {offsets = [0, 0], sizes = [2, 64], strides = [1, 1]} : vector<2x192xf32> to vector<2x64xf32>
    %12 = vector.extract_strided_slice %10 {offsets = [0, 0], sizes = [2, 64], strides = [1, 1]} : vector<2x192xf32> to vector<2x64xf32>
    %13 = arith.addf %11, %12 : vector<2x64xf32>
    %14 = arith.negf %13 : vector<2x64xf32>
    %15 = math.exp %14 : vector<2x64xf32>
    %cst_11 = arith.constant 1.000000e+00 : f32
    %16 = vector.broadcast %cst_11 : f32 to vector<2x64xf32>
    %17 = arith.addf %16, %15 : vector<2x64xf32>
    %18 = arith.divf %16, %17 : vector<2x64xf32>
    %19 = vector.extract_strided_slice %9 {offsets = [0, 64], sizes = [2, 64], strides = [1, 1]} : vector<2x192xf32> to vector<2x64xf32>
    %20 = vector.extract_strided_slice %10 {offsets = [0, 64], sizes = [2, 64], strides = [1, 1]} : vector<2x192xf32> to vector<2x64xf32>
    %21 = arith.addf %19, %20 : vector<2x64xf32>
    %22 = arith.negf %21 : vector<2x64xf32>
    %23 = math.exp %22 : vector<2x64xf32>
    %cst_12 = arith.constant 1.000000e+00 : f32
    %24 = vector.broadcast %cst_12 : f32 to vector<2x64xf32>
    %25 = arith.addf %24, %23 : vector<2x64xf32>
    %26 = arith.divf %24, %25 : vector<2x64xf32>
    %27 = vector.extract_strided_slice %9 {offsets = [0, 128], sizes = [2, 64], strides = [1, 1]} : vector<2x192xf32> to vector<2x64xf32>
    %28 = vector.extract_strided_slice %10 {offsets = [0, 128], sizes = [2, 64], strides = [1, 1]} : vector<2x192xf32> to vector<2x64xf32>
    %29 = vector.broadcast %1 : vector<1x64xf32> to vector<2x64xf32>
    %30 = arith.addf %28, %29 : vector<2x64xf32>
    %31 = arith.mulf %18, %30 : vector<2x64xf32>
    %32 = arith.addf %27, %31 : vector<2x64xf32>
    %33 = math.tanh %32 : vector<2x64xf32>
    %cst_13 = arith.constant 1.000000e+00 : f32
    %34 = vector.broadcast %cst_13 : f32 to vector<2x64xf32>
    %35 = arith.subf %34, %26 : vector<2x64xf32>
    %36 = arith.mulf %35, %33 : vector<2x64xf32>
    %37 = arith.mulf %26, %8 : vector<2x64xf32>
    %38 = arith.addf %36, %37 : vector<2x64xf32>
    %39 = vector.extract_strided_slice %7 {offsets = [2, 0], sizes = [2, 192], strides = [1, 1]} : vector<16x192xf32> to vector<2x192xf32>
    %cst_14 = arith.constant dense<0.000000e+00> : vector<2x192xf32>
    %40 = tpu.matmul %38, %0, %cst_14 {dimension_numbers = #tpu.dot_dimension_numbers<[1], [0], [0], [1], [0, 0, 1, 1], [], []>} : vector<2x64xf32>, vector<64x192xf32>, vector<2x192xf32> -> vector<2x192xf32>
    %41 = vector.extract_strided_slice %39 {offsets = [0, 0], sizes = [2, 64], strides = [1, 1]} : vector<2x192xf32> to vector<2x64xf32>
    %42 = vector.extract_strided_slice %40 {offsets = [0, 0], sizes = [2, 64], strides = [1, 1]} : vector<2x192xf32> to vector<2x64xf32>
    %43 = arith.addf %41, %42 : vector<2x64xf32>
    %44 = arith.negf %43 : vector<2x64xf32>
    %45 = math.exp %44 : vector<2x64xf32>
    %cst_15 = arith.constant 1.000000e+00 : f32
    %46 = vector.broadcast %cst_15 : f32 to vector<2x64xf32>
    %47 = arith.addf %46, %45 : vector<2x64xf32>
    %48 = arith.divf %46, %47 : vector<2x64xf32>
    %49 = vector.extract_strided_slice %39 {offsets = [0, 64], sizes = [2, 64], strides = [1, 1]} : vector<2x192xf32> to vector<2x64xf32>
    %50 = vector.extract_strided_slice %40 {offsets = [0, 64], sizes = [2, 64], strides = [1, 1]} : vector<2x192xf32> to vector<2x64xf32>
    %51 = arith.addf %49, %50 : vector<2x64xf32>
    %52 = arith.negf %51 : vector<2x64xf32>
    %53 = math.exp %52 : vector<2x64xf32>
    %cst_16 = arith.constant 1.000000e+00 : f32
    %54 = vector.broadcast %cst_16 : f32 to vector<2x64xf32>
    %55 = arith.addf %54, %53 : vector<2x64xf32>
    %56 = arith.divf %54, %55 : vector<2x64xf32>
    %57 = vector.extract_strided_slice %39 {offsets = [0, 128], sizes = [2, 64], strides = [1, 1]} : vector<2x192xf32> to vector<2x64xf32>
    %58 = vector.extract_strided_slice %40 {offsets = [0, 128], sizes = [2, 64], strides = [1, 1]} : vector<2x192xf32> to vector<2x64xf32>
    %59 = vector.broadcast %1 : vector<1x64xf32> to vector<2x64xf32>
    %60 = arith.addf %58, %59 : vector<2x64xf32>
    %61 = arith.mulf %48, %60 : vector<2x64xf32>
    %62 = arith.addf %57, %61 : vector<2x64xf32>
    %63 = math.tanh %62 : vector<2x64xf32>
    %cst_17 = arith.constant 1.000000e+00 : f32
    %64 = vector.broadcast %cst_17 : f32 to vector<2x64xf32>
    %65 = arith.subf %64, %56 : vector<2x64xf32>
    %66 = arith.mulf %65, %63 : vector<2x64xf32>
    %67 = arith.mulf %56, %38 : vector<2x64xf32>
    %68 = arith.addf %66, %67 : vector<2x64xf32>
    %69 = vector.extract_strided_slice %7 {offsets = [4, 0], sizes = [2, 192], strides = [1, 1]} : vector<16x192xf32> to vector<2x192xf32>
    %cst_18 = arith.constant dense<0.000000e+00> : vector<2x192xf32>
    %70 = tpu.matmul %68, %0, %cst_18 {dimension_numbers = #tpu.dot_dimension_numbers<[1], [0], [0], [1], [0, 0, 1, 1], [], []>} : vector<2x64xf32>, vector<64x192xf32>, vector<2x192xf32> -> vector<2x192xf32>
    %71 = vector.extract_strided_slice %69 {offsets = [0, 0], sizes = [2, 64], strides = [1, 1]} : vector<2x192xf32> to vector<2x64xf32>
    %72 = vector.extract_strided_slice %70 {offsets = [0, 0], sizes = [2, 64], strides = [1, 1]} : vector<2x192xf32> to vector<2x64xf32>
    %73 = arith.addf %71, %72 : vector<2x64xf32>
    %74 = arith.negf %73 : vector<2x64xf32>
    %75 = math.exp %74 : vector<2x64xf32>
    %cst_19 = arith.constant 1.000000e+00 : f32
    %76 = vector.broadcast %cst_19 : f32 to vector<2x64xf32>
    %77 = arith.addf %76, %75 : vector<2x64xf32>
    %78 = arith.divf %76, %77 : vector<2x64xf32>
    %79 = vector.extract_strided_slice %69 {offsets = [0, 64], sizes = [2, 64], strides = [1, 1]} : vector<2x192xf32> to vector<2x64xf32>
    %80 = vector.extract_strided_slice %70 {offsets = [0, 64], sizes = [2, 64], strides = [1, 1]} : vector<2x192xf32> to vector<2x64xf32>
    %81 = arith.addf %79, %80 : vector<2x64xf32>
    %82 = arith.negf %81 : vector<2x64xf32>
    %83 = math.exp %82 : vector<2x64xf32>
    %cst_20 = arith.constant 1.000000e+00 : f32
    %84 = vector.broadcast %cst_20 : f32 to vector<2x64xf32>
    %85 = arith.addf %84, %83 : vector<2x64xf32>
    %86 = arith.divf %84, %85 : vector<2x64xf32>
    %87 = vector.extract_strided_slice %69 {offsets = [0, 128], sizes = [2, 64], strides = [1, 1]} : vector<2x192xf32> to vector<2x64xf32>
    %88 = vector.extract_strided_slice %70 {offsets = [0, 128], sizes = [2, 64], strides = [1, 1]} : vector<2x192xf32> to vector<2x64xf32>
    %89 = vector.broadcast %1 : vector<1x64xf32> to vector<2x64xf32>
    %90 = arith.addf %88, %89 : vector<2x64xf32>
    %91 = arith.mulf %78, %90 : vector<2x64xf32>
    %92 = arith.addf %87, %91 : vector<2x64xf32>
    %93 = math.tanh %92 : vector<2x64xf32>
    %cst_21 = arith.constant 1.000000e+00 : f32
    %94 = vector.broadcast %cst_21 : f32 to vector<2x64xf32>
    %95 = arith.subf %94, %86 : vector<2x64xf32>
    %96 = arith.mulf %95, %93 : vector<2x64xf32>
    %97 = arith.mulf %86, %68 : vector<2x64xf32>
    %98 = arith.addf %96, %97 : vector<2x64xf32>
    %99 = vector.extract_strided_slice %7 {offsets = [6, 0], sizes = [2, 192], strides = [1, 1]} : vector<16x192xf32> to vector<2x192xf32>
    %cst_22 = arith.constant dense<0.000000e+00> : vector<2x192xf32>
    %100 = tpu.matmul %98, %0, %cst_22 {dimension_numbers = #tpu.dot_dimension_numbers<[1], [0], [0], [1], [0, 0, 1, 1], [], []>} : vector<2x64xf32>, vector<64x192xf32>, vector<2x192xf32> -> vector<2x192xf32>
    %101 = vector.extract_strided_slice %99 {offsets = [0, 0], sizes = [2, 64], strides = [1, 1]} : vector<2x192xf32> to vector<2x64xf32>
    %102 = vector.extract_strided_slice %100 {offsets = [0, 0], sizes = [2, 64], strides = [1, 1]} : vector<2x192xf32> to vector<2x64xf32>
    %103 = arith.addf %101, %102 : vector<2x64xf32>
    %104 = arith.negf %103 : vector<2x64xf32>
    %105 = math.exp %104 : vector<2x64xf32>
    %cst_23 = arith.constant 1.000000e+00 : f32
    %106 = vector.broadcast %cst_23 : f32 to vector<2x64xf32>
    %107 = arith.addf %106, %105 : vector<2x64xf32>
    %108 = arith.divf %106, %107 : vector<2x64xf32>
    %109 = vector.extract_strided_slice %99 {offsets = [0, 64], sizes = [2, 64], strides = [1, 1]} : vector<2x192xf32> to vector<2x64xf32>
    %110 = vector.extract_strided_slice %100 {offsets = [0, 64], sizes = [2, 64], strides = [1, 1]} : vector<2x192xf32> to vector<2x64xf32>
    %111 = arith.addf %109, %110 : vector<2x64xf32>
    %112 = arith.negf %111 : vector<2x64xf32>
    %113 = math.exp %112 : vector<2x64xf32>
    %cst_24 = arith.constant 1.000000e+00 : f32
    %114 = vector.broadcast %cst_24 : f32 to vector<2x64xf32>
    %115 = arith.addf %114, %113 : vector<2x64xf32>
    %116 = arith.divf %114, %115 : vector<2x64xf32>
    %117 = vector.extract_strided_slice %99 {offsets = [0, 128], sizes = [2, 64], strides = [1, 1]} : vector<2x192xf32> to vector<2x64xf32>
    %118 = vector.extract_strided_slice %100 {offsets = [0, 128], sizes = [2, 64], strides = [1, 1]} : vector<2x192xf32> to vector<2x64xf32>
    %119 = vector.broadcast %1 : vector<1x64xf32> to vector<2x64xf32>
    %120 = arith.addf %118, %119 : vector<2x64xf32>
    %121 = arith.mulf %108, %120 : vector<2x64xf32>
    %122 = arith.addf %117, %121 : vector<2x64xf32>
    %123 = math.tanh %122 : vector<2x64xf32>
    %cst_25 = arith.constant 1.000000e+00 : f32
    %124 = vector.broadcast %cst_25 : f32 to vector<2x64xf32>
    %125 = arith.subf %124, %116 : vector<2x64xf32>
    %126 = arith.mulf %125, %123 : vector<2x64xf32>
    %127 = arith.mulf %116, %98 : vector<2x64xf32>
    %128 = arith.addf %126, %127 : vector<2x64xf32>
    %129 = vector.extract_strided_slice %7 {offsets = [8, 0], sizes = [2, 192], strides = [1, 1]} : vector<16x192xf32> to vector<2x192xf32>
    %cst_26 = arith.constant dense<0.000000e+00> : vector<2x192xf32>
    %130 = tpu.matmul %128, %0, %cst_26 {dimension_numbers = #tpu.dot_dimension_numbers<[1], [0], [0], [1], [0, 0, 1, 1], [], []>} : vector<2x64xf32>, vector<64x192xf32>, vector<2x192xf32> -> vector<2x192xf32>
    %131 = vector.extract_strided_slice %129 {offsets = [0, 0], sizes = [2, 64], strides = [1, 1]} : vector<2x192xf32> to vector<2x64xf32>
    %132 = vector.extract_strided_slice %130 {offsets = [0, 0], sizes = [2, 64], strides = [1, 1]} : vector<2x192xf32> to vector<2x64xf32>
    %133 = arith.addf %131, %132 : vector<2x64xf32>
    %134 = arith.negf %133 : vector<2x64xf32>
    %135 = math.exp %134 : vector<2x64xf32>
    %cst_27 = arith.constant 1.000000e+00 : f32
    %136 = vector.broadcast %cst_27 : f32 to vector<2x64xf32>
    %137 = arith.addf %136, %135 : vector<2x64xf32>
    %138 = arith.divf %136, %137 : vector<2x64xf32>
    %139 = vector.extract_strided_slice %129 {offsets = [0, 64], sizes = [2, 64], strides = [1, 1]} : vector<2x192xf32> to vector<2x64xf32>
    %140 = vector.extract_strided_slice %130 {offsets = [0, 64], sizes = [2, 64], strides = [1, 1]} : vector<2x192xf32> to vector<2x64xf32>
    %141 = arith.addf %139, %140 : vector<2x64xf32>
    %142 = arith.negf %141 : vector<2x64xf32>
    %143 = math.exp %142 : vector<2x64xf32>
    %cst_28 = arith.constant 1.000000e+00 : f32
    %144 = vector.broadcast %cst_28 : f32 to vector<2x64xf32>
    %145 = arith.addf %144, %143 : vector<2x64xf32>
    %146 = arith.divf %144, %145 : vector<2x64xf32>
    %147 = vector.extract_strided_slice %129 {offsets = [0, 128], sizes = [2, 64], strides = [1, 1]} : vector<2x192xf32> to vector<2x64xf32>
    %148 = vector.extract_strided_slice %130 {offsets = [0, 128], sizes = [2, 64], strides = [1, 1]} : vector<2x192xf32> to vector<2x64xf32>
    %149 = vector.broadcast %1 : vector<1x64xf32> to vector<2x64xf32>
    %150 = arith.addf %148, %149 : vector<2x64xf32>
    %151 = arith.mulf %138, %150 : vector<2x64xf32>
    %152 = arith.addf %147, %151 : vector<2x64xf32>
    %153 = math.tanh %152 : vector<2x64xf32>
    %cst_29 = arith.constant 1.000000e+00 : f32
    %154 = vector.broadcast %cst_29 : f32 to vector<2x64xf32>
    %155 = arith.subf %154, %146 : vector<2x64xf32>
    %156 = arith.mulf %155, %153 : vector<2x64xf32>
    %157 = arith.mulf %146, %128 : vector<2x64xf32>
    %158 = arith.addf %156, %157 : vector<2x64xf32>
    %159 = vector.extract_strided_slice %7 {offsets = [10, 0], sizes = [2, 192], strides = [1, 1]} : vector<16x192xf32> to vector<2x192xf32>
    %cst_30 = arith.constant dense<0.000000e+00> : vector<2x192xf32>
    %160 = tpu.matmul %158, %0, %cst_30 {dimension_numbers = #tpu.dot_dimension_numbers<[1], [0], [0], [1], [0, 0, 1, 1], [], []>} : vector<2x64xf32>, vector<64x192xf32>, vector<2x192xf32> -> vector<2x192xf32>
    %161 = vector.extract_strided_slice %159 {offsets = [0, 0], sizes = [2, 64], strides = [1, 1]} : vector<2x192xf32> to vector<2x64xf32>
    %162 = vector.extract_strided_slice %160 {offsets = [0, 0], sizes = [2, 64], strides = [1, 1]} : vector<2x192xf32> to vector<2x64xf32>
    %163 = arith.addf %161, %162 : vector<2x64xf32>
    %164 = arith.negf %163 : vector<2x64xf32>
    %165 = math.exp %164 : vector<2x64xf32>
    %cst_31 = arith.constant 1.000000e+00 : f32
    %166 = vector.broadcast %cst_31 : f32 to vector<2x64xf32>
    %167 = arith.addf %166, %165 : vector<2x64xf32>
    %168 = arith.divf %166, %167 : vector<2x64xf32>
    %169 = vector.extract_strided_slice %159 {offsets = [0, 64], sizes = [2, 64], strides = [1, 1]} : vector<2x192xf32> to vector<2x64xf32>
    %170 = vector.extract_strided_slice %160 {offsets = [0, 64], sizes = [2, 64], strides = [1, 1]} : vector<2x192xf32> to vector<2x64xf32>
    %171 = arith.addf %169, %170 : vector<2x64xf32>
    %172 = arith.negf %171 : vector<2x64xf32>
    %173 = math.exp %172 : vector<2x64xf32>
    %cst_32 = arith.constant 1.000000e+00 : f32
    %174 = vector.broadcast %cst_32 : f32 to vector<2x64xf32>
    %175 = arith.addf %174, %173 : vector<2x64xf32>
    %176 = arith.divf %174, %175 : vector<2x64xf32>
    %177 = vector.extract_strided_slice %159 {offsets = [0, 128], sizes = [2, 64], strides = [1, 1]} : vector<2x192xf32> to vector<2x64xf32>
    %178 = vector.extract_strided_slice %160 {offsets = [0, 128], sizes = [2, 64], strides = [1, 1]} : vector<2x192xf32> to vector<2x64xf32>
    %179 = vector.broadcast %1 : vector<1x64xf32> to vector<2x64xf32>
    %180 = arith.addf %178, %179 : vector<2x64xf32>
    %181 = arith.mulf %168, %180 : vector<2x64xf32>
    %182 = arith.addf %177, %181 : vector<2x64xf32>
    %183 = math.tanh %182 : vector<2x64xf32>
    %cst_33 = arith.constant 1.000000e+00 : f32
    %184 = vector.broadcast %cst_33 : f32 to vector<2x64xf32>
    %185 = arith.subf %184, %176 : vector<2x64xf32>
    %186 = arith.mulf %185, %183 : vector<2x64xf32>
    %187 = arith.mulf %176, %158 : vector<2x64xf32>
    %188 = arith.addf %186, %187 : vector<2x64xf32>
    %189 = vector.extract_strided_slice %7 {offsets = [12, 0], sizes = [2, 192], strides = [1, 1]} : vector<16x192xf32> to vector<2x192xf32>
    %cst_34 = arith.constant dense<0.000000e+00> : vector<2x192xf32>
    %190 = tpu.matmul %188, %0, %cst_34 {dimension_numbers = #tpu.dot_dimension_numbers<[1], [0], [0], [1], [0, 0, 1, 1], [], []>} : vector<2x64xf32>, vector<64x192xf32>, vector<2x192xf32> -> vector<2x192xf32>
    %191 = vector.extract_strided_slice %189 {offsets = [0, 0], sizes = [2, 64], strides = [1, 1]} : vector<2x192xf32> to vector<2x64xf32>
    %192 = vector.extract_strided_slice %190 {offsets = [0, 0], sizes = [2, 64], strides = [1, 1]} : vector<2x192xf32> to vector<2x64xf32>
    %193 = arith.addf %191, %192 : vector<2x64xf32>
    %194 = arith.negf %193 : vector<2x64xf32>
    %195 = math.exp %194 : vector<2x64xf32>
    %cst_35 = arith.constant 1.000000e+00 : f32
    %196 = vector.broadcast %cst_35 : f32 to vector<2x64xf32>
    %197 = arith.addf %196, %195 : vector<2x64xf32>
    %198 = arith.divf %196, %197 : vector<2x64xf32>
    %199 = vector.extract_strided_slice %189 {offsets = [0, 64], sizes = [2, 64], strides = [1, 1]} : vector<2x192xf32> to vector<2x64xf32>
    %200 = vector.extract_strided_slice %190 {offsets = [0, 64], sizes = [2, 64], strides = [1, 1]} : vector<2x192xf32> to vector<2x64xf32>
    %201 = arith.addf %199, %200 : vector<2x64xf32>
    %202 = arith.negf %201 : vector<2x64xf32>
    %203 = math.exp %202 : vector<2x64xf32>
    %cst_36 = arith.constant 1.000000e+00 : f32
    %204 = vector.broadcast %cst_36 : f32 to vector<2x64xf32>
    %205 = arith.addf %204, %203 : vector<2x64xf32>
    %206 = arith.divf %204, %205 : vector<2x64xf32>
    %207 = vector.extract_strided_slice %189 {offsets = [0, 128], sizes = [2, 64], strides = [1, 1]} : vector<2x192xf32> to vector<2x64xf32>
    %208 = vector.extract_strided_slice %190 {offsets = [0, 128], sizes = [2, 64], strides = [1, 1]} : vector<2x192xf32> to vector<2x64xf32>
    %209 = vector.broadcast %1 : vector<1x64xf32> to vector<2x64xf32>
    %210 = arith.addf %208, %209 : vector<2x64xf32>
    %211 = arith.mulf %198, %210 : vector<2x64xf32>
    %212 = arith.addf %207, %211 : vector<2x64xf32>
    %213 = math.tanh %212 : vector<2x64xf32>
    %cst_37 = arith.constant 1.000000e+00 : f32
    %214 = vector.broadcast %cst_37 : f32 to vector<2x64xf32>
    %215 = arith.subf %214, %206 : vector<2x64xf32>
    %216 = arith.mulf %215, %213 : vector<2x64xf32>
    %217 = arith.mulf %206, %188 : vector<2x64xf32>
    %218 = arith.addf %216, %217 : vector<2x64xf32>
    %219 = vector.extract_strided_slice %7 {offsets = [14, 0], sizes = [2, 192], strides = [1, 1]} : vector<16x192xf32> to vector<2x192xf32>
    %cst_38 = arith.constant dense<0.000000e+00> : vector<2x192xf32>
    %220 = tpu.matmul %218, %0, %cst_38 {dimension_numbers = #tpu.dot_dimension_numbers<[1], [0], [0], [1], [0, 0, 1, 1], [], []>} : vector<2x64xf32>, vector<64x192xf32>, vector<2x192xf32> -> vector<2x192xf32>
    %221 = vector.extract_strided_slice %219 {offsets = [0, 0], sizes = [2, 64], strides = [1, 1]} : vector<2x192xf32> to vector<2x64xf32>
    %222 = vector.extract_strided_slice %220 {offsets = [0, 0], sizes = [2, 64], strides = [1, 1]} : vector<2x192xf32> to vector<2x64xf32>
    %223 = arith.addf %221, %222 : vector<2x64xf32>
    %224 = arith.negf %223 : vector<2x64xf32>
    %225 = math.exp %224 : vector<2x64xf32>
    %cst_39 = arith.constant 1.000000e+00 : f32
    %226 = vector.broadcast %cst_39 : f32 to vector<2x64xf32>
    %227 = arith.addf %226, %225 : vector<2x64xf32>
    %228 = arith.divf %226, %227 : vector<2x64xf32>
    %229 = vector.extract_strided_slice %219 {offsets = [0, 64], sizes = [2, 64], strides = [1, 1]} : vector<2x192xf32> to vector<2x64xf32>
    %230 = vector.extract_strided_slice %220 {offsets = [0, 64], sizes = [2, 64], strides = [1, 1]} : vector<2x192xf32> to vector<2x64xf32>
    %231 = arith.addf %229, %230 : vector<2x64xf32>
    %232 = arith.negf %231 : vector<2x64xf32>
    %233 = math.exp %232 : vector<2x64xf32>
    %cst_40 = arith.constant 1.000000e+00 : f32
    %234 = vector.broadcast %cst_40 : f32 to vector<2x64xf32>
    %235 = arith.addf %234, %233 : vector<2x64xf32>
    %236 = arith.divf %234, %235 : vector<2x64xf32>
    %237 = vector.extract_strided_slice %219 {offsets = [0, 128], sizes = [2, 64], strides = [1, 1]} : vector<2x192xf32> to vector<2x64xf32>
    %238 = vector.extract_strided_slice %220 {offsets = [0, 128], sizes = [2, 64], strides = [1, 1]} : vector<2x192xf32> to vector<2x64xf32>
    %239 = vector.broadcast %1 : vector<1x64xf32> to vector<2x64xf32>
    %240 = arith.addf %238, %239 : vector<2x64xf32>
    %241 = arith.mulf %228, %240 : vector<2x64xf32>
    %242 = arith.addf %237, %241 : vector<2x64xf32>
    %243 = math.tanh %242 : vector<2x64xf32>
    %cst_41 = arith.constant 1.000000e+00 : f32
    %244 = vector.broadcast %cst_41 : f32 to vector<2x64xf32>
    %245 = arith.subf %244, %236 : vector<2x64xf32>
    %246 = arith.mulf %245, %243 : vector<2x64xf32>
    %247 = arith.mulf %236, %218 : vector<2x64xf32>
    %248 = arith.addf %246, %247 : vector<2x64xf32>
    %c0_42 = arith.constant 0 : index
    %c0_43 = arith.constant 0 : index
    %249 = vector.load %arg5[%c0_42, %c0_43] : memref<64x32xf32, #tpu.memory_space<vmem>>, vector<64x32xf32>
    %cst_44 = arith.constant dense<0.000000e+00> : vector<2x32xf32>
    %250 = tpu.matmul %248, %249, %cst_44 {dimension_numbers = #tpu.dot_dimension_numbers<[1], [0], [0], [1], [0, 0, 1, 1], [], []>} : vector<2x64xf32>, vector<64x32xf32>, vector<2x32xf32> -> vector<2x32xf32>
    %c0_45 = arith.constant 0 : index
    %c0_46 = arith.constant 0 : index
    %251 = vector.load %arg6[%c0_45, %c0_46] : memref<1x32xf32, #tpu.memory_space<vmem>>, vector<1x32xf32>
    %252 = vector.broadcast %251 : vector<1x32xf32> to vector<2x32xf32>
    %253 = arith.addf %250, %252 : vector<2x32xf32>
    %c0_47 = arith.constant 0 : index
    %c0_48 = arith.constant 0 : index
    %254 = vector.load %arg7[%c0_47, %c0_48] : memref<2x32xf32, #tpu.memory_space<vmem>>, vector<2x32xf32>
    tpu.vector_store %arg7[%c0_47, %c0_48], %253 {strides = array<i32>} : memref<2x32xf32, #tpu.memory_space<vmem>>, vector<2x32xf32>,
    return
  }
}

</mosaic_0001>

<bundles_post_ra>
// kernel: tpu_custom_call.1
= control target key start
LH: loop header
LB: loop body
LE: loop exit
PB: predicated region body
PF: predicated region fallthrough
CT: control target
= control target key end

     0   :  { %12 = vsyncpa [#allocation3], 0  ;;  %s1660_s0 = inlined_call_operand.vmem [shape: f32[16,8], index: 0, kind: input, shape index: {}]   ;;  %s1661_s1 = inlined_call_operand.vmem [shape: f32[8,192], index: 1, kind: input, shape index: {}]   ;;  %s1662_s2 = inlined_call_operand.hbm [shape: f32[64,192], index: 2, kind: input, shape index: {}]   ;;  %s1663_s3 = inlined_call_operand.vmem [shape: f32[1,192], index: 3, kind: input, shape index: {}]   ;;  %s1664_s4 = inlined_call_operand.vmem [shape: f32[1,64], index: 4, kind: input, shape index: {}]   ;;  %s1665_s5 = inlined_call_operand.vmem [shape: f32[64,32], index: 5, kind: input, shape index: {}]   ;;  %s1666_s6 = inlined_call_operand.vmem [shape: f32[1,32], index: 6, kind: input, shape index: {}]   ;;  %s1667_s7 = inlined_call_operand.hbm [shape: f32[2,32], index: 7, kind: output, shape index: {}]  }
   0x1   :  { %13 = vsyncpa [#allocation4], 0  ;;  %s1377_s24 = smov [#allocation2]   ;;  %s1329_s28 = scalar_lea.hbm %s1662_s2, 2048 }
   0x2   :  { %s23_s25 = sshll.u32 %s1377_s24, 4  ;;  %p1330_p0 = scmp.ne.s32.totalorder %s1662_s2, %s1329_s28  ;;  %s24_s25 = int_to_ptr.vmem [resolvable:$true] %s23_s25 }
   0x3   :  { %p1333_p1 = scmp.lt.u32.totalorder %s1329_s28, %s1662_s2 }
   0x5   :  { %p1335_p2 = pnand %p1333_p1, %p1330_p0 }
   0x7   :  { %1338 = shalt.err (!%p1335_p2)
}
   0x8   :  { %s1339_s10 = scalar_lea.vmem %s24_s25, 2048  ;;  %p1344_p4 = scmp.lt.s32.totalorder %s24_s25, %s24_s25 }
   0x9   :  { %p1340_p3 = scmp.ne.s32.totalorder %s24_s25, %s1339_s10  ;;  %p1345_p5 = scmp.lt.s32.totalorder %s1339_s10, %s1339_s10 }
   0xb   :  { %p1346_p6 = por %p1345_p5, %p1344_p4 }
   0xd   :  { %p1347_p7 = pnand %p1346_p6, %p1340_p3 }
   0xf   :  { %1350 = shalt.err (!%p1347_p7)
}
  0x10   :  { %s1378_s11 = smov 256   ;;  %s1379_s12 = smov 16  }
  0x11   :  { %29 = dma.hbm_to_vmem [thread:$0]  %s1662_s2, 2048, %s24_s25, [#allocation3], %s1378_s11, %s1378_s11, %s1379_s12  }
  0x12   :  { %1373 = dma.done.wait [#allocation3], 2048  }
  0x13   :  { %1374 = vsyncadd [#allocation3], 4294965248  ;;  %v1380_v0 = vmov 0.0   ;;  %v42_v1 = vld [vmem:[#allocation2 + $0x8] sm:$0xff]  ;;  %v44_v2 = vld [vmem:[#allocation2 + $0x18] sm:$0xff]  ;;  %vm74_vm0 = vcmask 64512   ;;  %v64_v28 = vlaneseq }
  0x14   :  { %145 = vmatprep.mubr.f32.mxu0 %v1380_v0  ;;  %226 = vmatprep.mubr.f32.mxu1 %v1380_v0  ;;  %v41_v3 = vld [vmem:[#allocation2] sm:$0xff]  ;;  %v1439_v4 = vpack.c.bf16 %v44_v2, %v42_v1  ;;  %v43_v5 = vld [vmem:[#allocation2 + $0x10] sm:$0xff]  ;;  %v46_v6 = vld [vmem:[#allocation2 + $0x28] sm:$0xff]  ;;  %vm158_vm1 = vcmask 523264   ;;  %vm1383_vm2 = vmmov 0   ;;  %s1384_s17 = smov [#allocation5]  }
  0x15   :  { %v48_v7 = vld [vmem:[#allocation2 + $0x38] sm:$0xff]  ;;  %v1441_v8 = vpack.c.bf16 %v43_v5, %v41_v3  ;;  %v45_v10 = vld [vmem:[#allocation2 + $0x20] sm:$0xff]  ;;  %v47_v11 = vld [vmem:[#allocation2 + $0x30] sm:$0xff]  ;;  %v65_v29 = vshrl.u32 %v64_v28, 7  ;;  %vm1068_vm3 = vcmask 254976  }
  0x16   :  { %v1443_v9 = vpack.c.bf16 %v48_v7, %v46_v6  ;;  %v50_v12 = vld [vmem:[#allocation2 + $0x48] sm:$0xff]  ;;  %1134 = vmatprep.subr.bf16.mxu1 %v1439_v4  ;;  %v52_v13 = vld [vmem:[#allocation2 + $0x58] sm:$0xff]  ;;  %v1447_v14 = vpack.c.bf16 %v47_v11, %v45_v10  ;;  %v60_v16 = vld [vmem:[%s1661_s1] sm:$0xff] }
  0x17   :  { %1136 = vmatpush1.bf16.msra.mxu1 %v1441_v8  ;;  %v61_v15 = vld [vmem:[%s1661_s1 + $0x8] sm:$0xff]  ;;  %v1456_v17 = vpack.c.bf16 %v52_v13, %v50_v12  ;;  %v49_v18 = vld [vmem:[#allocation2 + $0x40] sm:$0xff]  ;;  %v51_v19 = vld [vmem:[#allocation2 + $0x50] sm:$0xff]  ;;  %v66_v31 = vsub.s32 0, %v65_v29  ;;  %v70_v42 = vsub.s32 1, %v65_v29 }
  0x18   :  { %1138 = vmatprep.subr.bf16.mxu1 %v1443_v9  ;;  %81 = vmatprep.subr.mxu0 %v61_v15  ;;  %v58_v20 = vld [vmem:[%s1660_s0] sm:$0xff]  ;;  %v54_v21 = vld [vmem:[#allocation2 + $0x68] sm:$0xff]  ;;  %v56_v22 = vld [vmem:[#allocation2 + $0x78] sm:$0xff]  ;;  %v1464_v23 = vpack.c.bf16 %v51_v19, %v49_v18 }
  0x19   :  { %82 = vmatpush1.msra.mxu0 %v60_v16  ;;  %v1468_v24 = vpack.c.bf16 %v56_v22, %v54_v21  ;;  %v53_v25 = vld [vmem:[#allocation2 + $0x60] sm:$0xff]  ;;  %v55_v26 = vld [vmem:[#allocation2 + $0x70] sm:$0xff]  ;;  %v59_v50 = vld [vmem:[%s1660_s0 + $0x8] sm:$0xff] }
  0x1a   :  { %1085 = vmatmul.mubr.msk.f32.vlgmr.msra.gmra.mrb[0].mxu0 %vm74_vm0, %v58_v20  ;;  %1150 = vmatprep.subr.bf16.mxu0 %v1439_v4  ;;  %v1473_v27 = vpack.c.bf16 %v55_v26, %v53_v25  ;;  %v62_v33 = vld [vmem:[%s1663_s3] sm:$0x3] }
  0x1b   :  { %1140 = vmatpush1.bf16.msra.mxu1 %v1447_v14  ;;  %1152 = vmatpush1.bf16.msra.mxu0 %v1441_v8  ;;  %v1497_v34 = vrot.slane %v62_v33, %v66_v31  ;;  %v1506_v43 = vld [vmem:[%s1664_s4] ss:$0 sm:$0xff]  ;;  %v1508_v44 = vrot.slane %v62_v33, %v70_v42  ;;  %s1381_s4 = smov 64  }
  0x1c   :  { %1142 = vmatprep.subr.bf16.mxu1 %v1456_v17  ;;  %1154 = vmatprep.subr.bf16.mxu0 %v1443_v9 }
  0x1d   :  { %151 = vmatprep.mubr.f32.mxu0 %v1380_v0 }
  0x1e   :  { %1086 = vmatmul.mubr.msk.f32.gmra.mrb[2].mxu0 %vm74_vm0, %v59_v50 }
  0x1f   :  { %1144 = vmatpush1.bf16.msra.mxu1 %v1464_v23  ;;  %1156 = vmatpush1.bf16.msra.mxu0 %v1447_v14 }
  0x20   :  { %1146 = vmatprep.subr.bf16.mxu1 %v1468_v24  ;;  %1158 = vmatprep.subr.bf16.mxu0 %v1456_v17 }
  0x21   :  { %327 = vmatprep.mubr.f32.mxu0 %v1380_v0 }
  0x23   :  { %1148 = vmatpush1.bf16.msra.mxu1 %v1473_v27  ;;  %1160 = vmatpush1.bf16.msra.mxu0 %v1464_v23 }
  0x24   :  { %1162 = vmatprep.subr.bf16.mxu0 %v1468_v24  ;;  %1166 = vmatprep.subr.bf16.mxu1 %v1439_v4 }
  0x26   :  { %227 = vmatmul.mubr.f32.vlgmr.msra.gmra.mrb[0].mxu1 %v1380_v0 }
  0x27   :  { %1164 = vmatpush1.bf16.msra.mxu0 %v1473_v27  ;;  %1168 = vmatpush1.bf16.msra.mxu1 %v1441_v8 }
  0x28   :  { %1170 = vmatprep.subr.bf16.mxu1 %v1443_v9  ;;  %431 = vmatprep.mubr.f32.mxu1 %v1380_v0 }
  0x29   :  { %1182 = vmatprep.subr.bf16.mxu0 %v1439_v4 }
  0x2b   :  { %1172 = vmatpush1.bf16.msra.mxu1 %v1447_v14 }
  0x2c   :  { %1174 = vmatprep.subr.bf16.mxu1 %v1456_v17 }
  0x2f   :  { %1176 = vmatpush1.bf16.msra.mxu1 %v1464_v23 }
  0x30   :  { %1178 = vmatprep.subr.bf16.mxu1 %v1468_v24 }
  0x33   :  { %1180 = vmatpush1.bf16.msra.mxu1 %v1473_v27 }
  0x34   :  { %1198 = vmatprep.subr.bf16.mxu1 %v1439_v4 }
  0xed   :  { %v147_v30 = vpop.f32.mrb[0].mxu0 }
  0xee   :  { %v149_v32 = vpop.f32.mrb[1].mxu0  ;;  %v1500_v35 = vadd.f32 %v147_v30, %v1497_v34 }
  0xef   :  { %v1512_v47 = vadd.f32 %v149_v32, %v1508_v44 }
  0xf1   :  { %v1522_v57 = vpop.f32.mrb[2].mxu0 }
  0xf2   :  { %v1524_v58 = vpop.f32.mrb[3].mxu0 }
  0xf9   :  { %v228_v36 = vpop.f32.mrb[0].mxu1 }
  0xfa   :  { %v233_v37 = vadd.f32 %v228_v36, %v1500_v35  ;;  %v230_v38 = vpop.f32.mrb[1].mxu1 }
  0xfb   :  { %v246_v45 = vadd.f32 %v1506_v43, %v230_v38 }
  0xfc   :  { %v1087_v39 = vmul.f32 -1.442695, %v233_v37 }
  0xfe   :  { %1281 = vpow2.f32 %v1087_v39 }
 0x108   :  { %v1282_v40 = vpop.eup %1281 }
 0x109   :  { %v237_v41 = vadd.f32 1.0, %v1282_v40 }
 0x10b   :  { %1283 = vrcp.f32 %v237_v41 }
 0x115   :  { %v1284_v46 = vpop.eup %1283 }
 0x116   :  { %v247_v48 = vmul.f32 %v1284_v46, %v246_v45  ;;  %v250_v52 = vsub.f32 1.0, %v1284_v46  ;;  %v256_v54 = vmul.f32 0.0, %v1284_v46 }
 0x118   :  { %v248_v49 = vadd.f32 %v247_v48, %v1512_v47 }
 0x11a   :  { %1285 = vtanh.f32 %v248_v49 }
 0x124   :  { %v1286_v51 = vpop.eup %1285 }
 0x125   :  { %252 = vrot.lane.b32.xlu0 %v1286_v51, %s1381_s4 }
 0x197   :  { %v253_v53 = vpop.permute.xlu0 %252 }
 0x198   :  { %v255_v55 = vmul.f32 %v253_v53, %v250_v52 }
 0x19a   :  { %v257_v56 = vadd.f32 %v256_v54, %v255_v55 }
 0x19c   :  { %259 = vrot.lane.b32.xlu0 %v257_v56, %s1381_s4  ;;  %v357_v6 = vrot.slane %v257_v56, 6 }
 0x20e   :  { %v260_v59 = vpop.permute.xlu0 %259 }
 0x20f   :  { %1089 = vmatmul.mubr.msk.f32.vlgmr.msra.gmra.mrb[4].mxu0 %vm158_vm1, %v260_v59 }
 0x210   :  { %1184 = vmatpush1.bf16.msra.mxu0 %v1441_v8  ;;  %535 = vmatprep.mubr.f32.mxu0 %v1380_v0 }
 0x211   :  { %1186 = vmatprep.subr.bf16.mxu0 %v1443_v9 }
 0x214   :  { %1188 = vmatpush1.bf16.msra.mxu0 %v1447_v14 }
 0x215   :  { %1190 = vmatprep.subr.bf16.mxu0 %v1456_v17 }
 0x218   :  { %1192 = vmatpush1.bf16.msra.mxu0 %v1464_v23 }
 0x219   :  { %1194 = vmatprep.subr.bf16.mxu0 %v1468_v24 }
 0x21c   :  { %1196 = vmatpush1.bf16.msra.mxu0 %v1473_v27 }
 0x21d   :  { %1214 = vmatprep.subr.bf16.mxu0 %v1439_v4 }
 0x2e2   :  { %v329_v60 = vpop.f32.mrb[4].mxu0 }
 0x2e3   :  { %v335_v61 = vrot.slane %v329_v60, 6  ;;  %v331_v62 = vpop.f32.mrb[5].mxu0 }
 0x2e4   :  { %v344_v5 = vadd.f32 %v1506_v43, %v331_v62 }
 0x2e5   :  { %v337_v63 = vadd.f32 %v335_v61, %v1500_v35 }
 0x2e6   :  { %v346_v7 = vrot.slane %v344_v5, 6 }
 0x2e7   :  { %v1090_v1 = vmul.f32 -1.442695, %v337_v63 }
 0x2e9   :  { %1287 = vpow2.f32 %v1090_v1 }
 0x2f3   :  { %v1288_v2 = vpop.eup %1287 }
 0x2f4   :  { %v341_v3 = vadd.f32 1.0, %v1288_v2 }
 0x2f6   :  { %1289 = vrcp.f32 %v341_v3 }
 0x300   :  { %v1290_v10 = vpop.eup %1289 }
 0x301   :  { %v348_v11 = vmul.f32 %v1290_v10, %v346_v7  ;;  %v359_v12 = vmul.f32 %v1290_v10, %v357_v6  ;;  %v351_v16 = vsub.f32 1.0, %v1290_v10 }
 0x303   :  { %v349_v13 = vadd.f32 %v348_v11, %v1512_v47 }
 0x305   :  { %1291 = vtanh.f32 %v349_v13 }
 0x30f   :  { %v1292_v15 = vpop.eup %1291 }
 0x310   :  { %353 = vrot.lane.b32.xlu1 %v1292_v15, %s1381_s4 }
 0x382   :  { %v354_v18 = vpop.permute.xlu1 %353 }
 0x383   :  { %v356_v19 = vmul.f32 %v354_v18, %v351_v16 }
 0x385   :  { %v360_v20 = vadd.f32 %v359_v12, %v356_v19 }
 0x387   :  { %v362_v21 = vrot.slane %v360_v20, 2  ;;  %v461_v36 = vrot.slane %v360_v20, 6 }
 0x389   :  { %363 = vrot.lane.b32.xlu1 %v362_v21, %s1381_s4 }
 0x3fb   :  { %v364_v22 = vpop.permute.xlu1 %363 }
 0x3fc   :  { %1091 = vmatmul.mubr.msk.f32.vlgmr.msra.gmra.mrb[2].mxu1 %vm158_vm1, %v364_v22 }
 0x3fd   :  { %1200 = vmatpush1.bf16.msra.mxu1 %v1441_v8  ;;  %639 = vmatprep.mubr.f32.mxu1 %v1380_v0 }
 0x3fe   :  { %1202 = vmatprep.subr.bf16.mxu1 %v1443_v9 }
 0x401   :  { %1204 = vmatpush1.bf16.msra.mxu1 %v1447_v14 }
 0x402   :  { %1206 = vmatprep.subr.bf16.mxu1 %v1456_v17 }
 0x405   :  { %1208 = vmatpush1.bf16.msra.mxu1 %v1464_v23 }
 0x406   :  { %1210 = vmatprep.subr.bf16.mxu1 %v1468_v24 }
 0x409   :  { %1212 = vmatpush1.bf16.msra.mxu1 %v1473_v27 }
 0x40a   :  { %1230 = vmatprep.subr.bf16.mxu1 %v1439_v4 }
 0x4cf   :  { %v433_v25 = vpop.f32.mrb[2].mxu1 }
 0x4d0   :  { %v439_v26 = vrot.slane %v433_v25, 4  ;;  %v435_v28 = vpop.f32.mrb[3].mxu1  ;;  %v1588_v25 = vadd.f32 %v1524_v58, %v1508_v44 }
 0x4d1   :  { %v448_v33 = vadd.f32 %v1506_v43, %v435_v28 }
 0x4d2   :  { %v441_v29 = vadd.f32 %v439_v26, %v1500_v35 }
 0x4d3   :  { %v450_v37 = vrot.slane %v448_v33, 4 }
 0x4d4   :  { %v1092_v30 = vmul.f32 -1.442695, %v441_v29 }
 0x4d6   :  { %1293 = vpow2.f32 %v1092_v30 }
 0x4e0   :  { %v1294_v31 = vpop.eup %1293 }
 0x4e1   :  { %v445_v32 = vadd.f32 1.0, %v1294_v31 }
 0x4e3   :  { %1295 = vrcp.f32 %v445_v32 }
 0x4ed   :  { %v1296_v38 = vpop.eup %1295 }
 0x4ee   :  { %v452_v39 = vmul.f32 %v1296_v38, %v450_v37  ;;  %v463_v40 = vmul.f32 %v1296_v38, %v461_v36  ;;  %v455_v45 = vsub.f32 1.0, %v1296_v38 }
 0x4f0   :  { %v453_v41 = vadd.f32 %v452_v39, %v1512_v47 }
 0x4f2   :  { %1297 = vtanh.f32 %v453_v41 }
 0x4fc   :  { %v1298_v42 = vpop.eup %1297 }
 0x4fd   :  { %457 = vrot.lane.b32.xlu0 %v1298_v42, %s1381_s4 }
 0x56f   :  { %v458_v46 = vpop.permute.xlu0 %457 }
 0x570   :  { %v460_v48 = vmul.f32 %v458_v46, %v455_v45 }
 0x572   :  { %v464_v49 = vadd.f32 %v463_v40, %v460_v48 }
 0x574   :  { %v466_v50 = vrot.slane %v464_v49, 4  ;;  %v565_v62 = vrot.slane %v464_v49, 6 }
 0x576   :  { %467 = vrot.lane.b32.xlu1 %v466_v50, %s1381_s4 }
 0x5e8   :  { %v468_v51 = vpop.permute.xlu1 %467 }
 0x5e9   :  { %1093 = vmatmul.mubr.msk.f32.vlgmr.msra.gmra.mrb[6].mxu0 %vm158_vm1, %v468_v51 }
 0x5ea   :  { %1216 = vmatpush1.bf16.msra.mxu0 %v1441_v8  ;;  %735 = vmatprep.mubr.f32.mxu0 %v1380_v0 }
 0x5eb   :  { %1218 = vmatprep.subr.bf16.mxu0 %v1443_v9 }
 0x5ee   :  { %1220 = vmatpush1.bf16.msra.mxu0 %v1447_v14 }
 0x5ef   :  { %1222 = vmatprep.subr.bf16.mxu0 %v1456_v17 }
 0x5f2   :  { %1224 = vmatpush1.bf16.msra.mxu0 %v1464_v23 }
 0x5f3   :  { %1226 = vmatprep.subr.bf16.mxu0 %v1468_v24 }
 0x5f6   :  { %1228 = vmatpush1.bf16.msra.mxu0 %v1473_v27 }
 0x5f7   :  { %1246 = vmatprep.subr.bf16.mxu0 %v1439_v4 }
 0x6bc   :  { %v537_v52 = vpop.f32.mrb[6].mxu0 }
 0x6bd   :  { %v543_v53 = vrot.slane %v537_v52, 2  ;;  %v539_v54 = vpop.f32.mrb[7].mxu0 }
 0x6be   :  { %v552_v61 = vadd.f32 %v1506_v43, %v539_v54 }
 0x6bf   :  { %v545_v55 = vadd.f32 %v543_v53, %v1500_v35 }
 0x6c0   :  { %v554_v63 = vrot.slane %v552_v61, 2 }
 0x6c1   :  { %v1094_v56 = vmul.f32 -1.442695, %v545_v55 }
 0x6c3   :  { %1299 = vpow2.f32 %v1094_v56 }
 0x6cd   :  { %v1300_v59 = vpop.eup %1299 }
 0x6ce   :  { %v549_v60 = vadd.f32 1.0, %v1300_v59 }
 0x6d0   :  { %1301 = vrcp.f32 %v549_v60 }
 0x6da   :  { %v1302_v1 = vpop.eup %1301 }
 0x6db   :  { %v556_v2 = vmul.f32 %v1302_v1, %v554_v63  ;;  %v567_v3 = vmul.f32 %v1302_v1, %v565_v62  ;;  %v559_v6 = vsub.f32 1.0, %v1302_v1 }
 0x6dd   :  { %v557_v5 = vadd.f32 %v556_v2, %v1512_v47  ;;  %v1582_v47 = vadd.f32 %v1522_v57, %v1497_v34 }
 0x6df   :  { %1303 = vtanh.f32 %v557_v5 }
 0x6e9   :  { %v1304_v4 = vpop.eup %1303 }
 0x6ea   :  { %561 = vrot.lane.b32.xlu0 %v1304_v4, %s1381_s4 }
 0x75c   :  { %v562_v35 = vpop.permute.xlu0 %561 }
 0x75d   :  { %v564_v7 = vmul.f32 %v562_v35, %v559_v6 }
 0x75f   :  { %v568_v10 = vadd.f32 %v567_v3, %v564_v7 }
 0x761   :  { %v570_v11 = vrot.slane %v568_v10, 6 }
 0x763   :  { %571 = vrot.lane.b32.xlu1 %v570_v11, %s1381_s4 }
 0x7d5   :  { %v572_v12 = vpop.permute.xlu1 %571 }
 0x7d6   :  { %1095 = vmatmul.mubr.msk.f32.vlgmr.msra.gmra.mrb[4].mxu1 %vm158_vm1, %v572_v12 }
 0x7d7   :  { %1232 = vmatpush1.bf16.msra.mxu1 %v1441_v8  ;;  %839 = vmatprep.mubr.f32.mxu1 %v1380_v0 }
 0x7d8   :  { %1234 = vmatprep.subr.bf16.mxu1 %v1443_v9 }
 0x7db   :  { %1236 = vmatpush1.bf16.msra.mxu1 %v1447_v14 }
 0x7dc   :  { %1238 = vmatprep.subr.bf16.mxu1 %v1456_v17 }
 0x7df   :  { %1240 = vmatpush1.bf16.msra.mxu1 %v1464_v23 }
 0x7e0   :  { %1242 = vmatprep.subr.bf16.mxu1 %v1468_v24 }
 0x7e3   :  { %1244 = vmatpush1.bf16.msra.mxu1 %v1473_v27 }
 0x8a9   :  { %v641_v13 = vpop.f32.mrb[4].mxu1 }
 0x8aa   :  { %v646_v15 = vadd.f32 %v641_v13, %v1582_v47  ;;  %v643_v16 = vpop.f32.mrb[5].mxu1 }
 0x8ab   :  { %v653_v21 = vadd.f32 %v1506_v43, %v643_v16 }
 0x8ac   :  { %v1096_v18 = vmul.f32 -1.442695, %v646_v15 }
 0x8ae   :  { %1305 = vpow2.f32 %v1096_v18 }
 0x8b8   :  { %v1306_v19 = vpop.eup %1305 }
 0x8b9   :  { %v650_v20 = vadd.f32 1.0, %v1306_v19 }
 0x8bb   :  { %1307 = vrcp.f32 %v650_v20 }
 0x8c5   :  { %v1308_v22 = vpop.eup %1307 }
 0x8c6   :  { %v654_v26 = vmul.f32 %v1308_v22, %v653_v21  ;;  %v657_v28 = vsub.f32 1.0, %v1308_v22  ;;  %v664_v30 = vmul.f32 %v1308_v22, %v570_v11 }
 0x8c8   :  { %v655_v34 = vadd.f32 %v654_v26, %v1588_v25 }
 0x8ca   :  { %1309 = vtanh.f32 %v655_v34 }
 0x8d4   :  { %v1310_v57 = vpop.eup %1309 }
 0x8d5   :  { %659 = vrot.lane.b32.xlu0 %v1310_v57, %s1381_s4 }
 0x947   :  { %v660_v29 = vpop.permute.xlu0 %659 }
 0x948   :  { %v662_v31 = vmul.f32 %v660_v29, %v657_v28 }
 0x94a   :  { %v665_v32 = vadd.f32 %v664_v30, %v662_v31  ;;  %v977_v30 = vld [vmem:[%s1665_s5] sm:$0xff]  ;;  %v1382_v31 = vmov 0.0|0.0  }
 0x94b   :  { %1261 = vmatprep.subr.bf16.mxu1 %v1382_v31 }
 0x94c   :  { %667 = vrot.lane.b32.xlu1 %v665_v32, %s1381_s4 }
 0x9be   :  { %v668_v33 = vpop.permute.xlu1 %667 }
 0x9bf   :  { %1097 = vmatmul.mubr.msk.f32.vlgmr.msra.gmra.mrb[8].mxu0 %vm158_vm1, %v668_v33 }
 0x9c0   :  { %1248 = vmatpush1.bf16.msra.mxu0 %v1441_v8  ;;  %943 = vmatprep.mubr.f32.mxu0 %v1380_v0 }
 0x9c1   :  { %1250 = vmatprep.subr.bf16.mxu0 %v1443_v9 }
 0x9c4   :  { %1252 = vmatpush1.bf16.msra.mxu0 %v1447_v14  ;;  %v765_v14 = vrot.slane %v665_v32, 6 }
 0x9c5   :  { %1254 = vmatprep.subr.bf16.mxu0 %v1456_v17 }
 0x9c8   :  { %1256 = vmatpush1.bf16.msra.mxu0 %v1464_v23 }
 0x9c9   :  { %1258 = vmatprep.subr.bf16.mxu0 %v1468_v24 }
 0x9cc   :  { %1260 = vmatpush1.bf16.msra.mxu0 %v1473_v27 }
 0xa92   :  { %v737_v44 = vpop.f32.mrb[8].mxu0 }
 0xa93   :  { %v743_v58 = vrot.slane %v737_v44, 6  ;;  %v739_v36 = vpop.f32.mrb[9].mxu0  ;;  %v981_v44 = vld [vmem:[%s1665_s5 + $0x20] sm:$0xff] }
 0xa94   :  { %v752_v9 = vadd.f32 %v1506_v43, %v739_v36 }
 0xa95   :  { %v745_v37 = vadd.f32 %v743_v58, %v1582_v47  ;;  %v982_v58 = vld [vmem:[%s1665_s5 + $0x28] sm:$0xff] }
 0xa96   :  { %v754_v17 = vrot.slane %v752_v9, 6 }
 0xa97   :  { %v1098_v8 = vmul.f32 -1.442695, %v745_v37  ;;  %v1268_v37 = vpack.c.bf16 %v982_v58, %v981_v44 }
 0xa99   :  { %1311 = vpow2.f32 %v1098_v8  ;;  %v984_v8 = vld [vmem:[%s1665_s5 + $0x38] sm:$0xff] }
 0xaa3   :  { %v1312_v38 = vpop.eup %1311 }
 0xaa4   :  { %v749_v39 = vadd.f32 1.0, %v1312_v38 }
 0xaa6   :  { %1313 = vrcp.f32 %v749_v39 }
 0xab0   :  { %v1314_v40 = vpop.eup %1313 }
 0xab1   :  { %v756_v23 = vmul.f32 %v1314_v40, %v754_v17  ;;  %v767_v41 = vmul.f32 %v1314_v40, %v765_v14  ;;  %v759_v42 = vsub.f32 1.0, %v1314_v40 }
 0xab3   :  { %v757_v24 = vadd.f32 %v756_v23, %v1588_v25 }
 0xab5   :  { %1315 = vtanh.f32 %v757_v24 }
 0xabf   :  { %v1316_v27 = vpop.eup %1315 }
 0xac0   :  { %761 = vrot.lane.b32.xlu0 %v1316_v27, %s1381_s4 }
 0xb32   :  { %v762_v45 = vpop.permute.xlu0 %761 }
 0xb33   :  { %v764_v46 = vmul.f32 %v762_v45, %v759_v42 }
 0xb35   :  { %v768_v48 = vadd.f32 %v767_v41, %v764_v46  ;;  %v1103_v41 = vld [vmem:[%s1666_s6] ss:$0 sm:$0xff] }
 0xb37   :  { %v770_v49 = vrot.slane %v768_v48, 2  ;;  %v869_v61 = vrot.slane %v768_v48, 6 }
 0xb39   :  { %771 = vrot.lane.b32.xlu1 %v770_v49, %s1381_s4 }
 0xbab   :  { %v772_v50 = vpop.permute.xlu1 %771 }
 0xbac   :  { %1099 = vmatmul.mubr.msk.f32.vlgmr.msra.gmra.mrb[6].mxu1 %vm158_vm1, %v772_v50 }
 0xbad   :  { %1130 = vmatprep.mubr.msk.f32.mxu1 %vm1383_vm2, %v1380_v0  ;;  %v983_v0 = vld [vmem:[%s1665_s5 + $0x30] sm:$0xff] }
 0xbae   :  { %v1271_v38 = vpack.c.bf16 %v984_v8, %v983_v0 }
 0xc7f   :  { %v841_v51 = vpop.f32.mrb[6].mxu1 }
 0xc80   :  { %v847_v52 = vrot.slane %v841_v51, 4  ;;  %v843_v53 = vpop.f32.mrb[7].mxu1 }
 0xc81   :  { %v856_v60 = vadd.f32 %v1506_v43, %v843_v53 }
 0xc82   :  { %v849_v54 = vadd.f32 %v847_v52, %v1582_v47 }
 0xc83   :  { %v858_v62 = vrot.slane %v856_v60, 4 }
 0xc84   :  { %v1100_v55 = vmul.f32 -1.442695, %v849_v54 }
 0xc86   :  { %1317 = vpow2.f32 %v1100_v55 }
 0xc90   :  { %v1318_v56 = vpop.eup %1317 }
 0xc91   :  { %v853_v59 = vadd.f32 1.0, %v1318_v56 }
 0xc93   :  { %1319 = vrcp.f32 %v853_v59 }
 0xc9d   :  { %v1320_v63 = vpop.eup %1319 }
 0xc9e   :  { %v860_v1 = vmul.f32 %v1320_v63, %v858_v62  ;;  %v871_v2 = vmul.f32 %v1320_v63, %v869_v61  ;;  %v863_v4 = vsub.f32 1.0, %v1320_v63 }
 0xca0   :  { %v861_v3 = vadd.f32 %v860_v1, %v1588_v25 }
 0xca2   :  { %1321 = vtanh.f32 %v861_v3 }
 0xcac   :  { %v1322_v5 = vpop.eup %1321 }
 0xcad   :  { %865 = vrot.lane.b32.xlu0 %v1322_v5, %s1381_s4 }
 0xd1f   :  { %v866_v6 = vpop.permute.xlu0 %865 }
 0xd20   :  { %v868_v35 = vmul.f32 %v866_v6, %v863_v4 }
 0xd22   :  { %v872_v7 = vadd.f32 %v871_v2, %v868_v35 }
 0xd24   :  { %v874_v10 = vrot.slane %v872_v7, 4  ;;  %v973_v22 = vrot.slane %v872_v7, 6 }
 0xd26   :  { %875 = vrot.lane.b32.xlu1 %v874_v10, %s1381_s4 }
 0xd98   :  { %v876_v11 = vpop.permute.xlu1 %875 }
 0xd99   :  { %1101 = vmatmul.mubr.msk.f32.vlgmr.msra.gmra.mrb[10].mxu0 %vm158_vm1, %v876_v11 }
 0xe6c   :  { %v945_v12 = vpop.f32.mrb[10].mxu0 }
 0xe6d   :  { %v951_v13 = vrot.slane %v945_v12, 2  ;;  %v947_v15 = vpop.f32.mrb[11].mxu0 }
 0xe6e   :  { %v960_v21 = vadd.f32 %v1506_v43, %v947_v15  ;;  %v979_v43 = vld [vmem:[%s1665_s5 + $0x10] sm:$0xff] }
 0xe6f   :  { %v953_v16 = vadd.f32 %v951_v13, %v1582_v47  ;;  %v978_v47 = vld [vmem:[%s1665_s5 + $0x8] sm:$0xff] }
 0xe70   :  { %v962_v26 = vrot.slane %v960_v21, 2  ;;  %v1262_v32 = vpack.c.bf16 %v978_v47, %v977_v30 }
 0xe71   :  { %v1102_v18 = vmul.f32 -1.442695, %v953_v16 }
 0xe72   :  { %1263 = vmatpush3.bf16.msra.mxu1 %v1262_v32 }
 0xe73   :  { %1323 = vpow2.f32 %v1102_v18  ;;  %1264 = vmatprep.subr.bf16.mxu1 %v1382_v31 }
 0xe7d   :  { %v1324_v19 = vpop.eup %1323 }
 0xe7e   :  { %v957_v20 = vadd.f32 1.0, %v1324_v19 }
 0xe80   :  { %1325 = vrcp.f32 %v957_v20 }
 0xe8a   :  { %v1326_v34 = vpop.eup %1325 }
 0xe8b   :  { %v964_v57 = vmul.f32 %v1326_v34, %v962_v26  ;;  %v975_v28 = vmul.f32 %v1326_v34, %v973_v22  ;;  %v967_v39 = vsub.f32 1.0, %v1326_v34 }
 0xe8d   :  { %v965_v29 = vadd.f32 %v964_v57, %v1588_v25  ;;  %v980_v25 = vld [vmem:[%s1665_s5 + $0x18] sm:$0xff]  ;;  %s1076_s5 = sshll.u32 %s1384_s17, 4  ;;  %s1077_s5 = int_to_ptr.vmem [resolvable:$true] %s1076_s5 }
 0xe8e   :  { %v1265_v33 = vpack.c.bf16 %v980_v25, %v979_v43  ;;  %s1351_s18 = scalar_lea.vmem %s1077_s5, 32  ;;  %p1356_p9 = scmp.lt.s32.totalorder %s1077_s5, %s1077_s5 }
 0xe8f   :  { %1327 = vtanh.f32 %v965_v29  ;;  %p1352_p8 = scmp.ne.s32.totalorder %s1077_s5, %s1351_s18  ;;  %p1357_p10 = scmp.lt.s32.totalorder %s1351_s18, %s1351_s18 }
 0xe90   :  { %1266 = vmatpush3.bf16.msra.mxu1 %v1265_v33 }
 0xe91   :  { %1267 = vmatprep.subr.bf16.mxu1 %v1382_v31  ;;  %p1358_p11 = por %p1357_p10, %p1356_p9 }
 0xe93   :  { %p1359_p12 = pnand %p1358_p11, %p1352_p8 }
 0xe94   :  { %1269 = vmatpush3.bf16.msra.mxu1 %v1268_v37 }
 0xe95   :  { %1270 = vmatprep.subr.bf16.mxu1 %v1382_v31 }
 0xe98   :  { %1272 = vmatpush3.bf16.msra.mxu1 %v1271_v38 }
 0xe99   :  { %v1328_v36 = vpop.eup %1327 }
 0xe9a   :  { %969 = vrot.lane.b32.xlu0 %v1328_v36, %s1381_s4 }
 0xf0c   :  { %v970_v9 = vpop.permute.xlu0 %969 }
 0xf0d   :  { %v972_v14 = vmul.f32 %v970_v9, %v967_v39 }
 0xf0f   :  { %v976_v17 = vadd.f32 %v975_v28, %v972_v14 }
 0xf11   :  { %v993_v40 = vrot.slane %v976_v17, 6 }
 0xf13   :  { %994 = vrot.lane.b32.xlu1 %v993_v40, %s1381_s4 }
 0xf85   :  { %v995_v23 = vpop.permute.xlu1 %994 }
 0xf86   :  { %1131 = vmatmul.mubr.msk.f32.vlgmr.msra.gmra.mrb[8].mxu1 %vm158_vm1, %v995_v23 }
0x1059   :  { %v1064_v24 = vpop.f32.mrb[8].mxu1 }
0x105a   :  { %v1065_v27 = vadd.f32 %v1103_v41, %v1064_v24  ;;  %v1132_v42 = vpop.f32.mrb[9].mxu1 }
0x105c   :  { %1069 = vst.msk [vmem:[#allocation5] sm:$0x3] %vm1068_vm3, %v1065_v27 }
0x105d   :  { %1362 = shalt.err (!%p1359_p12)
}
0x105e   :  { %s1363_s20 = scalar_lea.hbm %s1667_s7, 32 }
0x105f   :  { %p1364_p13 = scmp.ne.s32.totalorder %s1667_s7, %s1363_s20  ;;  %p1367_p0 = scmp.lt.u32.totalorder %s1363_s20, %s1667_s7 }
0x1061   :  { %p1369_p1 = pnand %p1367_p0, %p1364_p13 }
0x1063   :  { %1372 = shalt.err (!%p1369_p1)
}
0x1064   :  { %1079 = dma.vmem_to_hbm [thread:$0]  %s1077_s5, 32, %s1667_s7, [#allocation4]  }
0x1065   :  { %1375 = dma.done.wait [#allocation4], 32  }
0x1066   :  { %1376 = vsyncadd [#allocation4], 4294967264 }
0x1067   :  { %1083 = vsyncpa [#allocation3], 1 }
0x1068   :  { %1084 = vsyncpa [#allocation4], 1 }

</bundles_post_ra>
